<compile_context>
chip_gen: v5e
topology: v5e:2x2
jax: 0.10.0
libtpu: 0.0.40
codegen_flags: <defaults>
</compile_context>

<pallas_src>
import functools

import jax
import jax.numpy as jnp
from jax.experimental import pallas as pl
from jax.experimental.pallas import tpu as pltpu


def _round_up(x, m):
    return (x + m - 1) // m * m


def _ceil_div(a, b):
    return -(-a // b)


def pilot_mlp_kernel(x_ref,
                     w1_ref, b1_ref,
                     w2_ref, b2_ref,
                     w3_ref, b3_ref,
                     w4_ref, b4_ref,
                     out_ref,
                     *, matmul_dtype):
    """One batch tile of the fused forward pass: 4 matmuls + relu + softmax."""
    # x / w* already hold matmul_dtype (pre-cast in the wrapper); accumulate f32.
    h = jnp.dot(x_ref[...], w1_ref[...],
                preferred_element_type=jnp.float32) + b1_ref[...]
    h = jnp.maximum(h, 0.0)

    h = jnp.dot(h.astype(matmul_dtype), w2_ref[...],
                preferred_element_type=jnp.float32) + b2_ref[...]
    h = jnp.maximum(h, 0.0)

    h = jnp.dot(h.astype(matmul_dtype), w3_ref[...],
                preferred_element_type=jnp.float32) + b3_ref[...]
    h = jnp.maximum(h, 0.0)

    logits = jnp.dot(h.astype(matmul_dtype), w4_ref[...],
                     preferred_element_type=jnp.float32) + b4_ref[...]

    # Numerically stable softmax over the (small) feature axis.
    # Exact reciprocal on the (tb, 1) column + broadcast multiply replaces the
    # full-width divide (pl.reciprocal(approx=True) would break the 1e-5 tol).
    m = jnp.max(logits, axis=1, keepdims=True)
    e = jnp.exp(logits - m)
    inv = 1.0 / jnp.sum(e, axis=1, keepdims=True)
    out_ref[...] = e * inv


def pilot_forward(x, params, *, block_b=4096, matmul_dtype=jnp.float32,
                  core_parallel=False):
    """params: w1..w4 stored (in, out)-transposed, b1..b4 stored as (1, out)."""
    B, in_dim = x.shape
    out_dim = params["w4"].shape[1]

    # Waste-minimizing batch tiling: spread B as evenly as possible over the
    # minimum number of 8-aligned tiles no larger than block_b.
    n_steps = _ceil_div(B, block_b)
    tb = _round_up(_ceil_div(B, n_steps), 8)
    b_pad = n_steps * tb
    x_p = x if b_pad == B else jnp.pad(x, ((0, b_pad - B), (0, 0)))

    w1, w2, w3, w4 = params["w1"], params["w2"], params["w3"], params["w4"]
    if jnp.dtype(matmul_dtype) != jnp.dtype(jnp.float32):
        # Pre-cast matmul operands once in the wrapper (native bf16 MXU path on
        # v6e/v7x); biases / relu / softmax stay f32 inside the kernel.
        # NOTE: loosens accuracy below the 1e-5 reference tolerance.
        x_p = x_p.astype(matmul_dtype)
        w1, w2, w3, w4 = (w.astype(matmul_dtype) for w in (w1, w2, w3, w4))

    operands = (x_p,
                w1, params["b1"],
                w2, params["b2"],
                w3, params["b3"],
                w4, params["b4"])

    def resident_spec(arr):
        # Full-array block, constant index map -> parameters are loaded into
        # VMEM once and the window never changes, so they are not re-DMA'd
        # across grid steps (total param footprint ~28 KB).
        return pl.BlockSpec(arr.shape, lambda i: (0, 0))

    in_specs = [pl.BlockSpec((tb, in_dim), lambda i: (i, 0))]
    in_specs += [resident_spec(p) for p in operands[1:]]

    batch_sem = pltpu.CORE_PARALLEL if core_parallel else "parallel"

    out = pl.pallas_call(
        functools.partial(pilot_mlp_kernel, matmul_dtype=matmul_dtype),
        out_shape=jax.ShapeDtypeStruct((b_pad, out_dim), jnp.float32),
        grid=(n_steps,),
        in_specs=in_specs,
        out_specs=pl.BlockSpec((tb, out_dim), lambda i: (i, 0)),
        compiler_params=pltpu.CompilerParams(
            dimension_semantics=(batch_sem,),
            vmem_limit_bytes=32 * 1024 * 1024),
    )(*operands)

    return out if b_pad == B else out[:B]


def init_pilot_params(key, in_dim, h1, h2, h3, out_dim):
    """Deterministic init mimicking nn.Linear default (uniform +/- 1/sqrt(fan_in))."""
    dims = [(in_dim, h1), (h1, h2), (h2, h3), (h3, out_dim)]
    params = {}
    for idx, (fan_in, fan_out) in enumerate(dims, start=1):
        key, kw, kb = jax.random.split(key, 3)
        bound = 1.0 / jnp.sqrt(jnp.float32(fan_in))
        # PyTorch stores W as (out, in); we store the transpose (in, out).
        params[f"w{idx}"] = jax.random.uniform(
            kw, (fan_in, fan_out), jnp.float32, -bound, bound)
        params[f"b{idx}"] = jax.random.uniform(
            kb, (1, fan_out), jnp.float32, -bound, bound)
    return params


def pilot_forward_ref(x, params):
    """Pure-JAX reference for correctness checking."""
    h = jax.nn.relu(x @ params["w1"] + params["b1"])
    h = jax.nn.relu(h @ params["w2"] + params["b2"])
    h = jax.nn.relu(h @ params["w3"] + params["b3"])
    logits = h @ params["w4"] + params["b4"]
    return jax.nn.softmax(logits, axis=1)


if __name__ == "__main__":
    # Lunar-lander-like sizes: state dim 8, 4 discrete actions, small hiddens.
    in_dim, h1, h2, h3, out_dim = 8, 64, 64, 32, 4

    key = jax.random.PRNGKey(0)
    key, kx1, kx2 = jax.random.split(key, 3)
    params = init_pilot_params(key, in_dim, h1, h2, h3, out_dim)

    # Case 1: tiny online-inference batch (single grid step, tb = 8, no padding).
    x_small = jax.random.normal(kx1, (8, in_dim), jnp.float32)
    out_small = jax.block_until_ready(pilot_forward(x_small, params))
    ref_small = pilot_forward_ref(x_small, params)
    assert out_small.shape == (8, out_dim)
    assert jnp.allclose(jnp.sum(out_small, axis=1), 1.0, atol=1e-5)
    assert jnp.allclose(out_small, ref_small, atol=1e-5, rtol=1e-5)

    # Case 2: B=300 with the default block_b collapses to one grid step
    # (tb = 304, 4 padded rows instead of the old 212-row waste).
    x_big = jax.random.normal(kx2, (300, in_dim), jnp.float32)
    out_big = jax.block_until_ready(pilot_forward(x_big, params))
    ref_big = pilot_forward_ref(x_big, params)
    assert out_big.shape == (300, out_dim)
    assert jnp.allclose(jnp.sum(out_big, axis=1), 1.0, atol=1e-5)
    assert jnp.allclose(out_big, ref_big, atol=1e-5, rtol=1e-5)

    # Case 3: force a multi-step grid (block_b=128 -> 3 steps of tb=104) to
    # exercise the batch-blocked pipeline and the waste-minimizing tile choice.
    out_multi = jax.block_until_ready(pilot_forward(x_big, params, block_b=128))
    assert out_multi.shape == (300, out_dim)
    assert jnp.allclose(out_multi, ref_big, atol=1e-5, rtol=1e-5)

    # TODO(synk): Pilot.act() (Categorical sampling + log_prob) is host-side
    # policy logic, not part of forward(); not implemented as a kernel.

    print("KERNEL_OK")
</pallas_src>

<mosaic_0001>
module attributes {stable_mosaic.version = 11 : i64} {
  func.func @pilot_mlp_kernel(%arg0: i32, %arg1: memref<8x8xf32, #tpu.memory_space<vmem>>, %arg2: memref<8x64xf32, #tpu.memory_space<vmem>>, %arg3: memref<1x64xf32, #tpu.memory_space<vmem>>, %arg4: memref<64x64xf32, #tpu.memory_space<vmem>>, %arg5: memref<1x64xf32, #tpu.memory_space<vmem>>, %arg6: memref<64x32xf32, #tpu.memory_space<vmem>>, %arg7: memref<1x32xf32, #tpu.memory_space<vmem>>, %arg8: memref<32x4xf32, #tpu.memory_space<vmem>>, %arg9: memref<1x4xf32, #tpu.memory_space<vmem>>, %arg10: memref<8x4xf32, #tpu.memory_space<vmem>>) attributes {dimension_semantics = [#tpu.dimension_semantics<parallel>], iteration_bounds = array<i64: 1>, scalar_prefetch = 0 : i64, scratch_operands = 0 : i64, tpu.core_type = #tpu.core_type<tc>, window_params = [{transform_indices = @transform_0, window_bounds = array<i64: 8, 8>}, {pipeline_mode = #tpu.pipeline_mode<synchronous>, transform_indices = @transform_1, window_bounds = array<i64: 8, 64>}, {pipeline_mode = #tpu.pipeline_mode<synchronous>, transform_indices = @transform_2, window_bounds = array<i64: 1, 64>}, {pipeline_mode = #tpu.pipeline_mode<synchronous>, transform_indices = @transform_3, window_bounds = array<i64: 64, 64>}, {pipeline_mode = #tpu.pipeline_mode<synchronous>, transform_indices = @transform_4, window_bounds = array<i64: 1, 64>}, {pipeline_mode = #tpu.pipeline_mode<synchronous>, transform_indices = @transform_5, window_bounds = array<i64: 64, 32>}, {pipeline_mode = #tpu.pipeline_mode<synchronous>, transform_indices = @transform_6, window_bounds = array<i64: 1, 32>}, {pipeline_mode = #tpu.pipeline_mode<synchronous>, transform_indices = @transform_7, window_bounds = array<i64: 32, 4>}, {pipeline_mode = #tpu.pipeline_mode<synchronous>, transform_indices = @transform_8, window_bounds = array<i64: 1, 4>}, {transform_indices = @transform_9, window_bounds = array<i64: 8, 4>}]} {
    %c0 = arith.constant 0 : index
    %c0_0 = arith.constant 0 : index
    %0 = vector.load %arg1[%c0, %c0_0] : memref<8x8xf32, #tpu.memory_space<vmem>>, vector<8x8xf32>
    %c0_1 = arith.constant 0 : index
    %c0_2 = arith.constant 0 : index
    %1 = vector.load %arg2[%c0_1, %c0_2] : memref<8x64xf32, #tpu.memory_space<vmem>>, vector<8x64xf32>
    %cst = arith.constant dense<0.000000e+00> : vector<8x64xf32>
    %2 = tpu.matmul %0, %1, %cst {dimension_numbers = #tpu.dot_dimension_numbers<[1], [0], [0], [1], [0, 0, 1, 1], [], []>} : vector<8x8xf32>, vector<8x64xf32>, vector<8x64xf32> -> vector<8x64xf32>
    %c0_3 = arith.constant 0 : index
    %c0_4 = arith.constant 0 : index
    %3 = vector.load %arg3[%c0_3, %c0_4] : memref<1x64xf32, #tpu.memory_space<vmem>>, vector<1x64xf32>
    %4 = vector.broadcast %3 : vector<1x64xf32> to vector<8x64xf32>
    %5 = arith.addf %2, %4 : vector<8x64xf32>
    %cst_5 = arith.constant 0.000000e+00 : f32
    %6 = vector.broadcast %cst_5 : f32 to vector<8x64xf32>
    %7 = arith.maximumf %5, %6 : vector<8x64xf32>
    %c0_6 = arith.constant 0 : index
    %c0_7 = arith.constant 0 : index
    %8 = vector.load %arg4[%c0_6, %c0_7] : memref<64x64xf32, #tpu.memory_space<vmem>>, vector<64x64xf32>
    %cst_8 = arith.constant dense<0.000000e+00> : vector<8x64xf32>
    %9 = tpu.matmul %7, %8, %cst_8 {dimension_numbers = #tpu.dot_dimension_numbers<[1], [0], [0], [1], [0, 0, 1, 1], [], []>} : vector<8x64xf32>, vector<64x64xf32>, vector<8x64xf32> -> vector<8x64xf32>
    %c0_9 = arith.constant 0 : index
    %c0_10 = arith.constant 0 : index
    %10 = vector.load %arg5[%c0_9, %c0_10] : memref<1x64xf32, #tpu.memory_space<vmem>>, vector<1x64xf32>
    %11 = vector.broadcast %10 : vector<1x64xf32> to vector<8x64xf32>
    %12 = arith.addf %9, %11 : vector<8x64xf32>
    %cst_11 = arith.constant 0.000000e+00 : f32
    %13 = vector.broadcast %cst_11 : f32 to vector<8x64xf32>
    %14 = arith.maximumf %12, %13 : vector<8x64xf32>
    %c0_12 = arith.constant 0 : index
    %c0_13 = arith.constant 0 : index
    %15 = vector.load %arg6[%c0_12, %c0_13] : memref<64x32xf32, #tpu.memory_space<vmem>>, vector<64x32xf32>
    %cst_14 = arith.constant dense<0.000000e+00> : vector<8x32xf32>
    %16 = tpu.matmul %14, %15, %cst_14 {dimension_numbers = #tpu.dot_dimension_numbers<[1], [0], [0], [1], [0, 0, 1, 1], [], []>} : vector<8x64xf32>, vector<64x32xf32>, vector<8x32xf32> -> vector<8x32xf32>
    %c0_15 = arith.constant 0 : index
    %c0_16 = arith.constant 0 : index
    %17 = vector.load %arg7[%c0_15, %c0_16] : memref<1x32xf32, #tpu.memory_space<vmem>>, vector<1x32xf32>
    %18 = vector.broadcast %17 : vector<1x32xf32> to vector<8x32xf32>
    %19 = arith.addf %16, %18 : vector<8x32xf32>
    %cst_17 = arith.constant 0.000000e+00 : f32
    %20 = vector.broadcast %cst_17 : f32 to vector<8x32xf32>
    %21 = arith.maximumf %19, %20 : vector<8x32xf32>
    %c0_18 = arith.constant 0 : index
    %c0_19 = arith.constant 0 : index
    %22 = vector.load %arg8[%c0_18, %c0_19] : memref<32x4xf32, #tpu.memory_space<vmem>>, vector<32x4xf32>
    %cst_20 = arith.constant dense<0.000000e+00> : vector<8x4xf32>
    %23 = tpu.matmul %21, %22, %cst_20 {dimension_numbers = #tpu.dot_dimension_numbers<[1], [0], [0], [1], [0, 0, 1, 1], [], []>} : vector<8x32xf32>, vector<32x4xf32>, vector<8x4xf32> -> vector<8x4xf32>
    %c0_21 = arith.constant 0 : index
    %c0_22 = arith.constant 0 : index
    %24 = vector.load %arg9[%c0_21, %c0_22] : memref<1x4xf32, #tpu.memory_space<vmem>>, vector<1x4xf32>
    %25 = vector.broadcast %24 : vector<1x4xf32> to vector<8x4xf32>
    %26 = arith.addf %23, %25 : vector<8x4xf32>
    %cst_23 = arith.constant dense<0xFF800000> : vector<8xf32>
    %27 = vector.multi_reduction <maximumf>, %26, %cst_23 [1] : vector<8x4xf32> to vector<8xf32>
    %28 = vector.shape_cast %27 : vector<8xf32> to vector<8x1xf32>
    %29 = vector.broadcast %28 : vector<8x1xf32> to vector<8x4xf32>
    %30 = arith.subf %26, %29 : vector<8x4xf32>
    %31 = math.exp %30 : vector<8x4xf32>
    %cst_24 = arith.constant dense<0.000000e+00> : vector<8xf32>
    %32 = vector.multi_reduction <add>, %31, %cst_24 [1] : vector<8x4xf32> to vector<8xf32>
    %33 = vector.shape_cast %32 : vector<8xf32> to vector<8x1xf32>
    %cst_25 = arith.constant 1.000000e+00 : f32
    %34 = vector.broadcast %cst_25 : f32 to vector<8x1xf32>
    %35 = arith.divf %34, %33 : vector<8x1xf32>
    %36 = vector.broadcast %35 : vector<8x1xf32> to vector<8x4xf32>
    %37 = arith.mulf %31, %36 : vector<8x4xf32>
    %c0_26 = arith.constant 0 : index
    %c0_27 = arith.constant 0 : index
    %38 = vector.load %arg10[%c0_26, %c0_27] : memref<8x4xf32, #tpu.memory_space<vmem>>, vector<8x4xf32>
    tpu.vector_store %arg10[%c0_26, %c0_27], %37 {strides = array<i32>} : memref<8x4xf32, #tpu.memory_space<vmem>>, vector<8x4xf32>,
    return
  }
  func.func @transform_0(%arg0: i32) -> (i32, i32) {
    %c0_i32 = arith.constant 0 : i32
    %c0_i32_0 = arith.constant 0 : i32
    return %arg0, %c0_i32 : i32, i32
  }
  func.func @transform_1(%arg0: i32) -> (i32, i32) {
    %c0_i32 = arith.constant 0 : i32
    %c0_i32_0 = arith.constant 0 : i32
    %c0_i32_1 = arith.constant 0 : i32
    return %c0_i32, %c0_i32_0 : i32, i32
  }
  func.func @transform_2(%arg0: i32) -> (i32, i32) {
    %c0_i32 = arith.constant 0 : i32
    %c0_i32_0 = arith.constant 0 : i32
    %c0_i32_1 = arith.constant 0 : i32
    return %c0_i32, %c0_i32_0 : i32, i32
  }
  func.func @transform_3(%arg0: i32) -> (i32, i32) {
    %c0_i32 = arith.constant 0 : i32
    %c0_i32_0 = arith.constant 0 : i32
    %c0_i32_1 = arith.constant 0 : i32
    return %c0_i32, %c0_i32_0 : i32, i32
  }
  func.func @transform_4(%arg0: i32) -> (i32, i32) {
    %c0_i32 = arith.constant 0 : i32
    %c0_i32_0 = arith.constant 0 : i32
    %c0_i32_1 = arith.constant 0 : i32
    return %c0_i32, %c0_i32_0 : i32, i32
  }
  func.func @transform_5(%arg0: i32) -> (i32, i32) {
    %c0_i32 = arith.constant 0 : i32
    %c0_i32_0 = arith.constant 0 : i32
    %c0_i32_1 = arith.constant 0 : i32
    return %c0_i32, %c0_i32_0 : i32, i32
  }
  func.func @transform_6(%arg0: i32) -> (i32, i32) {
    %c0_i32 = arith.constant 0 : i32
    %c0_i32_0 = arith.constant 0 : i32
    %c0_i32_1 = arith.constant 0 : i32
    return %c0_i32, %c0_i32_0 : i32, i32
  }
  func.func @transform_7(%arg0: i32) -> (i32, i32) {
    %c0_i32 = arith.constant 0 : i32
    %c0_i32_0 = arith.constant 0 : i32
    %c0_i32_1 = arith.constant 0 : i32
    return %c0_i32, %c0_i32_0 : i32, i32
  }
  func.func @transform_8(%arg0: i32) -> (i32, i32) {
    %c0_i32 = arith.constant 0 : i32
    %c0_i32_0 = arith.constant 0 : i32
    %c0_i32_1 = arith.constant 0 : i32
    return %c0_i32, %c0_i32_0 : i32, i32
  }
  func.func @transform_9(%arg0: i32) -> (i32, i32) {
    %c0_i32 = arith.constant 0 : i32
    %c0_i32_0 = arith.constant 0 : i32
    return %arg0, %c0_i32 : i32, i32
  }
}

</mosaic_0001>

<bundles_post_ra>
// kernel: tpu_custom_call.1
= control target key start
LH: loop header
LB: loop body
LE: loop exit
PB: predicated region body
PF: predicated region fallthrough
CT: control target
= control target key end

     0   :  { %vm38_vm0 = vcmask 64512   ;;  %vm75_vm1 = vcmask 523264   ;;  %vm144_vm2 = vcmask 261120   ;;  %vm168_vm3 = vcmask 31744   ;;  %s347_s1 = inlined_call_operand.vmem [shape: f32[8,64], index: 1, kind: input, shape index: {}]   ;;  %s348_s0 = inlined_call_operand.vmem [shape: f32[8,8], index: 0, kind: input, shape index: {}]   ;;  %s349_s3 = inlined_call_operand.vmem [shape: f32[64,64], index: 3, kind: input, shape index: {}]   ;;  %s350_s2 = inlined_call_operand.vmem [shape: f32[1,64], index: 2, kind: input, shape index: {}]   ;;  %s351_s4 = inlined_call_operand.vmem [shape: f32[1,64], index: 4, kind: input, shape index: {}]   ;;  %s352_s5 = inlined_call_operand.vmem [shape: f32[64,32], index: 5, kind: input, shape index: {}]   ;;  %s353_s6 = inlined_call_operand.vmem [shape: f32[1,32], index: 6, kind: input, shape index: {}]   ;;  %s354_s7 = inlined_call_operand.vmem [shape: f32[32,4], index: 7, kind: input, shape index: {}]   ;;  %s355_s8 = inlined_call_operand.vmem [shape: f32[1,4], index: 8, kind: input, shape index: {}]   ;;  %s356_s9 = inlined_call_operand.vmem [shape: f32[8,4], index: 9, kind: output, shape index: {}]  }
   0x1   :  { %v33_v0 = vld [vmem:[%s347_s1] sm:$0xff]  ;;  %v70_v2 = vld [vmem:[%s349_s3 + $0x38] sm:$0xff]  ;;  %v69_v3 = vld [vmem:[%s349_s3 + $0x30] sm:$0xff] }
   0x2   :  { %v32_v1 = vld [vmem:[%s348_s0] sm:$0xff]  ;;  %57 = vmatpush.msra.mxu0 %v33_v0  ;;  %87 = vmatpush.msra.mxu1 %v70_v2  ;;  %v68_v4 = vld [vmem:[%s349_s3 + $0x28] sm:$0xff]  ;;  %v66_v6 = vld [vmem:[%s349_s3 + $0x18] sm:$0xff] }
   0x3   :  { %199 = vmatmul.msk.f32.vlgmr.msra.gmra.mxu0 %vm38_vm0, %v32_v1  ;;  %v67_v5 = vld [vmem:[%s349_s3 + $0x20] sm:$0xff]  ;;  %v65_v7 = vld [vmem:[%s349_s3 + $0x10] sm:$0xff]  ;;  %v64_v8 = vld [vmem:[%s349_s3 + $0x8] sm:$0xff] }
   0x4   :  { %88 = vmatpush.msra.mxu1 %v69_v3  ;;  %v63_v9 = vld [vmem:[%s349_s3] sm:$0xff]  ;;  %v107_v10 = vld [vmem:[%s352_s5 + $0x38] sm:$0xff]  ;;  %v106_v11 = vld [vmem:[%s352_s5 + $0x30] sm:$0xff] }
   0x5   :  { %123 = vmatpush.msra.mxu2 %v107_v10  ;;  %v105_v12 = vld [vmem:[%s352_s5 + $0x28] sm:$0xff]  ;;  %v104_v13 = vld [vmem:[%s352_s5 + $0x20] sm:$0xff]  ;;  %v103_v14 = vld [vmem:[%s352_s5 + $0x18] sm:$0xff] }
   0x6   :  { %89 = vmatpush.msra.mxu1 %v68_v4  ;;  %v203_v15 = vld [vmem:[%s350_s2] ss:$0 sm:$0xff]  ;;  %v102_v19 = vld [vmem:[%s352_s5 + $0x10] sm:$0xff]  ;;  %v101_v20 = vld [vmem:[%s352_s5 + $0x8] sm:$0xff] }
   0x7   :  { %124 = vmatpush.msra.mxu2 %v106_v11  ;;  %v100_v21 = vld [vmem:[%s352_s5] sm:$0xff]  ;;  %v139_v22 = vld [vmem:[%s354_s7 + $0x18] sm:$0xff]  ;;  %v138_v27 = vld [vmem:[%s354_s7 + $0x10] sm:$0xff] }
   0x8   :  { %90 = vmatpush.msra.mxu1 %v67_v5  ;;  %160 = vmatpush.msra.mxu3 %v139_v22  ;;  %v204_v23 = vld [vmem:[%s351_s4] ss:$0 sm:$0xff]  ;;  %v137_v28 = vld [vmem:[%s354_s7 + $0x8] sm:$0xff] }
   0x9   :  { %125 = vmatpush.msra.mxu2 %v105_v12  ;;  %v136_v29 = vld [vmem:[%s354_s7] sm:$0xff] }
   0xa   :  { %91 = vmatpush.msra.mxu1 %v66_v6  ;;  %161 = vmatpush.msra.mxu3 %v138_v27  ;;  %v205_v30 = vld [vmem:[%s353_s6] ss:$0 sm:$0xff] }
   0xb   :  { %126 = vmatpush.msra.mxu2 %v104_v13  ;;  %v206_v34 = vld [vmem:[%s355_s8] ss:$0 sm:$0xff] }
   0xc   :  { %92 = vmatpush.msra.mxu1 %v65_v7  ;;  %162 = vmatpush.msra.mxu3 %v137_v28 }
   0xd   :  { %127 = vmatpush.msra.mxu2 %v103_v14 }
   0xe   :  { %93 = vmatpush.msra.mxu1 %v64_v8  ;;  %163 = vmatpush.msra.mxu3 %v136_v29 }
   0xf   :  { %128 = vmatpush.msra.mxu2 %v102_v19 }
  0x10   :  { %94 = vmatpush.msra.mxu1 %v63_v9 }
  0x11   :  { %129 = vmatpush.msra.mxu2 %v101_v20 }
  0x13   :  { %130 = vmatpush.msra.mxu2 %v100_v21 }
  0x80   :  { %v59_v16 = vpop.f32.mrf.mxu0 }
  0x81   :  { %v60_v17 = vadd.f32 %v203_v15, %v59_v16 }
  0x83   :  { %v62_v18 = vmax.f32 %v60_v17, 0.0 }
  0x85   :  { %200 = vmatmul.msk.f32.vlgmr.msra.gmra.mxu1 %vm75_vm1, %v62_v18 }
 0x102   :  { %v96_v24 = vpop.f32.mrf.mxu1 }
 0x103   :  { %v97_v25 = vadd.f32 %v204_v23, %v96_v24 }
 0x105   :  { %v99_v26 = vmax.f32 %v97_v25, 0.0 }
 0x107   :  { %201 = vmatmul.msk.f32.vlgmr.msra.gmra.mxu2 %vm75_vm1, %v99_v26 }
 0x18a   :  { %v132_v31 = vpop.f32.mrf.mxu2 }
 0x18b   :  { %v133_v32 = vadd.f32 %v205_v30, %v132_v31 }
 0x18d   :  { %v135_v33 = vmax.f32 %v133_v32, 0.0 }
 0x18f   :  { %202 = vmatmul.msk.f32.vlgmr.msra.gmra.mxu3 %vm144_vm2, %v135_v33 }
 0x212   :  { %v165_v35 = vpop.f32.mrf.mxu3 }
 0x213   :  { %v166_v36 = vadd.f32 %v206_v34, %v165_v35 }
 0x215   :  { %v169_v37 = vsel %vm168_vm3, %v166_v36, -inf }
 0x216   :  { %170 = vmax.xlane.f32.xlu0 %v169_v37 }
 0x289   :  { %v171_v38 = vpop.xlane.xlu0 %170 }
 0x28a   :  { %v172_v39 = vsub.f32 %v166_v36, %v171_v38 }
 0x28c   :  { %v173_v40 = vmul.f32 1.442695, %v172_v39 }
 0x28e   :  { %207 = vpow2.f32 %v173_v40 }
 0x294   :  { %v208_v41 = vpop.eup %207 }
 0x295   :  { %v175_v42 = vsel %vm168_vm3, %v208_v41, 0.0 }
 0x296   :  { %176 = vadd.xlane.f32.xlu0 %v175_v42 }
 0x309   :  { %v177_v43 = vpop.xlane.xlu0 %176 }
 0x30a   :  { %209 = vrcp.f32 %v177_v43  ;;  %v189_v47 = vand.u32 2147483648, %v177_v43  ;;  %v187_v49 = vand.u32 2147483647, %v177_v43  ;;  %vm183_vm5 = vweird.f32 %v177_v43 }
 0x30c   :  { %v190_v51 = vor.u32 1.1754944e-38, %v189_v47  ;;  %vm188_vm7 = vcmp.eq.f32.partialorder %v187_v49, 8.507059e+37 }
 0x310   :  { %v210_v44 = vpop.eup %209 }
 0x311   :  { %v179_v45 = vmul.f32 %v210_v44, %v177_v43  ;;  %vm184_vm4 = vweird.f32 %v210_v44 }
 0x312   :  { %vm185_vm6 = vmor %vm183_vm5, %vm184_vm4 }
 0x313   :  { %v180_v46 = vsub.f32 1.0, %v179_v45 }
 0x315   :  { %v181_v48 = vmul.f32 %v210_v44, %v180_v46 }
 0x317   :  { %v182_v50 = vadd.f32 %v210_v44, %v181_v48 }
 0x319   :  { %v186_v52 = vsel %vm185_vm6, %v210_v44, %v182_v50 }
 0x31a   :  { %v191_v53 = vsel %vm188_vm7, %v190_v51, %v186_v52 }
 0x31b   :  { %v193_v54 = vmul.f32 %v208_v41, %v191_v53 }
 0x31d   :  { %194 = vst.msk [vmem:[%s356_s9] sm:$0xff] %vm168_vm3, %v193_v54 }

</bundles_post_ra>
